<compile_context>
chip_gen: v7x
topology: tpu7x:2x2x1
jax: 0.10.0
libtpu: 0.0.40
codegen_flags: <defaults>
</compile_context>

<pallas_src>
import itertools
from functools import partial

import jax
import jax.numpy as jnp
from jax import lax
from jax.experimental import pallas as pl
from jax.experimental.pallas import tpu as pltpu


# ----------------------------- slice helpers (ported from cebra, no torch) ---
def check_overlapping_feature_ranges(slice_list):
    for slice1, slice2 in itertools.combinations(slice_list, 2):
        if slice1.start < slice2.stop and slice1.stop > slice2.start:
            return True
    return False


def check_slices_for_gaps(slice_list):
    slice_list = sorted(slice_list, key=lambda s: s.start)
    for i in range(1, len(slice_list)):
        if slice_list[i - 1].stop < slice_list[i].start:
            raise ValueError(
                f"There is a gap in the slices {slice_list[i - 1]} and {slice_list[i]}")


def compute_renormalize_ranges(feature_ranges, sort=True):
    max_slice_dim = max(s.stop for s in feature_ranges)
    min_slice_dim = min(s.start for s in feature_ranges)
    full_emb_slice = slice(min_slice_dim, max_slice_dim)
    n_full = sum(1 for s in feature_ranges if s == full_emb_slice)
    if n_full > 1:
        raise ValueError("More than one slice covers the full embedding.")
    if n_full == 0:
        raise ValueError("Overlapping slices but none covers the full embedding.")
    rest = [s for s in feature_ranges if s != full_emb_slice]
    max_rest = max(s.stop for s in rest)
    min_rest = min(s.start for s in rest)
    remaining = []
    if full_emb_slice.start < min_rest:
        remaining.append(slice(full_emb_slice.start, min_rest))
    if full_emb_slice.stop > max_rest:
        remaining.append(slice(max_rest, full_emb_slice.stop))
    if len(remaining) == 0:
        raise ValueError("The behavior slices and the time slices coincide completely.")
    final_slices = remaining + rest
    if sort:
        final_slices = sorted(final_slices, key=lambda s: s.start)
    check_slices_for_gaps(final_slices)
    return final_slices


# ----------------------------------------------------------------- kernel ----
def _multiobjective_kernel(x_ref, w1t_ref, b1t_ref, w2t_ref, b2t_ref, out_ref,
                           *, renormalize, norm_ranges, gelu_approximate):
    """Fused MLP + per-range L2 normalization (lane-dense output).

    Shapes inside the kernel:
      x    : (TILE_B, in_dim)  f32   natural HBM row layout -> cast to bf16
      w1t  : (hidden, in_dim)  bf16  (resident)
      hT   : (hidden, TILE_B)  f32 accumulation (NT matmul: contract last dims)
      w2t  : (D, hidden)       bf16  (resident)
      yT   : (D, TILE_B)       f32
      out  : (D, TILE_B)       f32   (unmasked vst: TILE_B multiple of 128 or == B)
    """
    xb = x_ref[...].astype(jnp.bfloat16)                       # (TILE_B, in_dim)
    # hT = W1 @ x^T via NT matmul (contract dim 1 of both operands); the batch
    # tile lands on the MXU's wide N dimension -> no wrapper-side x.T needed.
    h = lax.dot_general(w1t_ref[...], xb, (((1,), (1,)), ((), ())),
                        preferred_element_type=jnp.float32) + b1t_ref[...]
    # approximate=True -> tanh GELU (EUP slot, review-recommended for v6e/v7x);
    # approximate=False -> exact erf (strict torch nn.GELU parity).
    h = jax.nn.gelu(h, approximate=gelu_approximate)
    y = (jnp.dot(w2t_ref[...], h.astype(jnp.bfloat16),
                 preferred_element_type=jnp.float32) + b2t_ref[...])   # (D, TILE_B)
    if renormalize:
        # Static per-range sum-of-squares along the feature (sublane) axis,
        # normalized with rsqrt (EUP slot); each segment is stored directly into
        # its out_ref slice (no concatenated temporary). Ranges are contiguous
        # and tile [0, D), so the stores cover the whole output block.
        for start, stop in norm_ranges:
            seg = y[start:stop, :]
            sumsq = jnp.sum(seg * seg, axis=0, keepdims=True)
            # no eps: matches torch `_Norm` (inp / torch.norm(inp, dim=1))
            out_ref[start:stop, :] = (seg * lax.rsqrt(sumsq)).astype(out_ref.dtype)
    else:
        out_ref[...] = y.astype(out_ref.dtype)


# -------------------------------------------------------------- JAX module ---
class SubspaceMultiobjectiveModel:
    """JAX/Pallas port of cebra's SubspaceMultiobjectiveModel wrapping an MLP."""

    def __init__(self, in_dim, hidden_dim, feature_ranges, renormalize,
                 split_outputs=True, key=None, max_tile_b=8192, min_grid_steps=8,
                 gelu_approximate=True):
        self.in_dim = in_dim
        self.hidden_dim = hidden_dim
        self.feature_ranges = feature_ranges
        self.renormalize = renormalize
        self.split_outputs = split_outputs
        # batch tile lives on the 128-lane axis; keep it a multiple of 128
        self.max_tile_b = max(128, (int(max_tile_b) // 128) * 128)
        self.min_grid_steps = max(1, int(min_grid_steps))
        self.gelu_approximate = gelu_approximate
        self.num_output = max(s.stop for s in feature_ranges)

        max_slice_dim = max(s.stop for s in feature_ranges)
        min_slice_dim = min(s.start for s in feature_ranges)
        if min_slice_dim != 0:
            raise ValueError(f"The first slice should start at 0, got {min_slice_dim}.")
        if max_slice_dim != self.num_output:
            raise ValueError("Slice dim / output dim mismatch.")
        check_slices_for_gaps(feature_ranges)
        self.renormalize_ranges = None
        if check_overlapping_feature_ranges(feature_ranges):
            self.renormalize_ranges = compute_renormalize_ranges(feature_ranges, sort=True)

        # The normalization ranges must exactly tile [0, D) (same implicit assumption
        # as the torch code's torch.cat along dim=1).
        if self.renormalize:
            if sum(stop - start for start, stop in self._norm_ranges()) != self.num_output:
                raise ValueError("Normalization ranges must exactly tile the embedding.")

        # deterministic synthetic parameters (Conv1d k=1 layers == dense layers),
        # stored transposed for the lane-dense kernel layout; matmul operands bf16.
        if key is None:
            key = jax.random.PRNGKey(0)
        k1, k2, k3, k4 = jax.random.split(key, 4)
        D = self.num_output
        self.w1t = (jax.random.normal(k1, (hidden_dim, in_dim), jnp.float32)
                    / jnp.sqrt(in_dim)).astype(jnp.bfloat16)          # (hidden, in)
        self.b1t = jax.random.normal(k2, (hidden_dim, 1), jnp.float32) * 0.01
        self.w2t = (jax.random.normal(k3, (D, hidden_dim), jnp.float32)
                    / jnp.sqrt(hidden_dim)).astype(jnp.bfloat16)      # (D, hidden)
        self.b2t = jax.random.normal(k4, (D, 1), jnp.float32) * 0.01

    # ------------------------------------------------------------- helpers ---
    def _norm_ranges(self):
        ranges = (self.renormalize_ranges
                  if self.renormalize_ranges is not None else self.feature_ranges)
        return tuple((s.start, s.stop) for s in ranges)

    @staticmethod
    def _pad_bytes(rows, cols, itemsize):
        # conservative VMEM footprint with native (8, 128) tiling
        r = ((rows + 7) // 8) * 8
        c = ((cols + 127) // 128) * 128
        return r * c * itemsize

    def _vmem_estimate(self, tile_b):
        D = self.num_output
        x_buf = self._pad_bytes(tile_b, self.in_dim, 4)       # narrow minor dim -> padded
        o_buf = self._pad_bytes(D, tile_b, 4)
        w_buf = (self._pad_bytes(self.hidden_dim, self.in_dim, 2)
                 + self._pad_bytes(D, self.hidden_dim, 2)
                 + self._pad_bytes(self.hidden_dim, 1, 4)
                 + self._pad_bytes(D, 1, 4))
        live = 2 * (x_buf + o_buf) + 2 * w_buf                 # double-buffered blocks
        live += (self._pad_bytes(self.hidden_dim, tile_b, 4)   # in-kernel f32 temporaries
                 + self._pad_bytes(D, tile_b, 4))
        return live

    def _vmem_limit_bytes(self, tile_b):
        est = self._vmem_estimate(tile_b)
        # generous headroom (also lifts v5e's 16 MiB scoped default), but never
        # above v7x's 64 MiB physical VMEM
        return int(min(max(2 * est + (4 << 20), 16 << 20), 64 << 20))

    def _choose_tile_b(self, B):
        # (a) tiny batches: single tile equal to the full batch (minor/second-minor
        #     dims equal to the full array extent satisfy the (8,128) rule even when
        #     B is not a multiple of 128).
        if B <= min(512, self.max_tile_b):
            return B
        # (b) lane-align to 128, cap by max_tile_b, and target >= min_grid_steps grid
        #     steps so the "parallel" batch axis shards across both v7x TensorCores
        #     and the pipeline has work to overlap.
        t = max(-(-B // self.min_grid_steps), 128)
        t = ((t + 127) // 128) * 128
        t = min(t, self.max_tile_b, ((B + 127) // 128) * 128)
        t = max(t, 128)
        # keep the (padded, double-buffered) block footprint well under physical VMEM
        while t > 128 and self._vmem_estimate(t) > (40 << 20):
            t = max(128, ((t // 2 + 127) // 128) * 128)
        return t

    # -------------------------------------------------------------- forward ---
    def __call__(self, x):
        """x: (batch, in_dim) float32 (== PyTorch NCT input with T=1)."""
        B = x.shape[0]
        D = self.num_output
        tile_b = self._choose_tile_b(B)
        grid = (pl.cdiv(B, tile_b),)

        kernel = partial(_multiobjective_kernel,
                         renormalize=self.renormalize,
                         norm_ranges=self._norm_ranges(),
                         gelu_approximate=self.gelu_approximate)

        # advisory cost estimate for XLA scheduling around the custom call
        flops = 2 * B * (self.in_dim * self.hidden_dim + self.hidden_dim * D)
        transcendentals = B * self.hidden_dim
        bytes_accessed = (B * (self.in_dim + D) * 4
                          + grid[0] * (self.hidden_dim * self.in_dim * 2
                                       + D * self.hidden_dim * 2
                                       + (self.hidden_dim + D) * 4))

        outT = pl.pallas_call(
            kernel,
            out_shape=jax.ShapeDtypeStruct((D, B), jnp.float32),
            grid=grid,
            in_specs=[
                pl.BlockSpec((tile_b, self.in_dim), lambda i: (i, 0)),           # x rows
                pl.BlockSpec((self.hidden_dim, self.in_dim), lambda i: (0, 0)),  # W1^T resident
                pl.BlockSpec((self.hidden_dim, 1), lambda i: (0, 0)),            # b1 resident
                pl.BlockSpec((D, self.hidden_dim), lambda i: (0, 0)),            # W2^T resident
                pl.BlockSpec((D, 1), lambda i: (0, 0)),                          # b2 resident
            ],
            out_specs=pl.BlockSpec((D, tile_b), lambda i: (0, i)),
            compiler_params=pltpu.CompilerParams(
                dimension_semantics=("parallel",),                   # dual-TC sharding on v7x
                vmem_limit_bytes=self._vmem_limit_bytes(tile_b)),
            cost_estimate=pl.CostEstimate(flops=int(flops),
                                          transcendentals=int(transcendentals),
                                          bytes_accessed=int(bytes_accessed)),
        )(x, self.w1t, self.b1t, self.w2t, self.b2t)

        if self.split_outputs:
            # single logical transpose; XLA fuses it into the mandatory per-range
            # split copies (contiguous last-dim slices of the (B, D) view).
            outB = outT.T
            return tuple(outB[:, s.start:s.stop] for s in self.feature_ranges)
        return outT.T

    # pure-JAX reference (same bf16-operand / f32-accumulation math) ----------
    def reference(self, x):
        xb = x.astype(jnp.bfloat16)
        h = lax.dot_general(self.w1t, xb, (((1,), (1,)), ((), ())),
                            preferred_element_type=jnp.float32) + self.b1t
        h = jax.nn.gelu(h, approximate=self.gelu_approximate)
        y = (jnp.dot(self.w2t, h.astype(jnp.bfloat16),
                     preferred_element_type=jnp.float32) + self.b2t)       # (D, B)
        if self.renormalize:
            parts = []
            for start, stop in self._norm_ranges():
                seg = y[start:stop, :]
                parts.append(seg / jnp.linalg.norm(seg, axis=0, keepdims=True))
            y = jnp.concatenate(parts, axis=0)
        yB = y.T
        if self.split_outputs:
            return tuple(yB[:, s.start:s.stop] for s in self.feature_ranges)
        return yB


# -------------------------------------------------------------------- main ---
if __name__ == "__main__":
    key = jax.random.PRNGKey(0)
    kx1, kp1, kx2, kp2, kx3, kp3 = jax.random.split(key, 6)

    # test 1: small batch, non-overlapping ranges, renormalize + split
    model = SubspaceMultiobjectiveModel(
        in_dim=16, hidden_dim=32,
        feature_ranges=[slice(0, 8), slice(8, 16)],
        renormalize=True, split_outputs=True, key=kp1)
    x = jax.random.normal(kx1, (8, 16), jnp.float32)
    outs = jax.block_until_ready(model(x))
    refs = model.reference(x)
    for o, r in zip(outs, refs):
        assert o.shape == r.shape
        assert jnp.allclose(o, r, atol=2e-3, rtol=2e-3), "mismatch vs reference (test 1)"

    # test 2: multi-tile grid (3 batch tiles of 128), overlapping feature ranges
    # (exercises compute_renormalize_ranges and the pipelined/parallel grid)
    model2 = SubspaceMultiobjectiveModel(
        in_dim=16, hidden_dim=32,
        feature_ranges=[slice(0, 16), slice(8, 16)],
        renormalize=True, split_outputs=True, key=kp2, max_tile_b=128)
    x2 = jax.random.normal(kx2, (384, 16), jnp.float32)
    outs2 = jax.block_until_ready(model2(x2))
    refs2 = model2.reference(x2)
    for o, r in zip(outs2, refs2):
        assert o.shape == r.shape
        assert jnp.allclose(o, r, atol=2e-3, rtol=2e-3), "mismatch vs reference (test 2)"

    # test 3: renormalize=False, split_outputs=False (raw embedding passthrough),
    # exact-erf GELU path (strict torch nn.GELU parity branch)
    model3 = SubspaceMultiobjectiveModel(
        in_dim=16, hidden_dim=32,
        feature_ranges=[slice(0, 8), slice(8, 16)],
        renormalize=False, split_outputs=False, key=kp3, gelu_approximate=False)
    x3 = jax.random.normal(kx3, (8, 16), jnp.float32)
    out3 = jax.block_until_ready(model3(x3))
    ref3 = model3.reference(x3)
    assert out3.shape == ref3.shape
    assert jnp.allclose(out3, ref3, atol=2e-3, rtol=2e-3), "mismatch vs reference (test 3)"

    print("KERNEL_OK")
</pallas_src>

<mosaic_0001>
module attributes {stable_mosaic.version = 11 : i64} {
  func.func @_multiobjective_kernel(%arg0: i32, %arg1: memref<8x16xf32, #tpu.memory_space<vmem>>, %arg2: memref<32x16xbf16, #tpu.memory_space<vmem>>, %arg3: memref<32x1xf32, #tpu.memory_space<vmem>>, %arg4: memref<16x32xbf16, #tpu.memory_space<vmem>>, %arg5: memref<16x1xf32, #tpu.memory_space<vmem>>, %arg6: memref<16x8xf32, #tpu.memory_space<vmem>>) attributes {dimension_semantics = [#tpu.dimension_semantics<parallel>], iteration_bounds = array<i64: 1>, scalar_prefetch = 0 : i64, scratch_operands = 0 : i64, tpu.core_type = #tpu.core_type<tc>, window_params = [{transform_indices = @transform_0, window_bounds = array<i64: 8, 16>}, {pipeline_mode = #tpu.pipeline_mode<synchronous>, transform_indices = @transform_1, window_bounds = array<i64: 32, 16>}, {pipeline_mode = #tpu.pipeline_mode<synchronous>, transform_indices = @transform_2, window_bounds = array<i64: 32, 1>}, {pipeline_mode = #tpu.pipeline_mode<synchronous>, transform_indices = @transform_3, window_bounds = array<i64: 16, 32>}, {pipeline_mode = #tpu.pipeline_mode<synchronous>, transform_indices = @transform_4, window_bounds = array<i64: 16, 1>}, {transform_indices = @transform_5, window_bounds = array<i64: 16, 8>}]} {
    %c0 = arith.constant 0 : index
    %c0_0 = arith.constant 0 : index
    %0 = vector.load %arg1[%c0, %c0_0] : memref<8x16xf32, #tpu.memory_space<vmem>>, vector<8x16xf32>
    %1 = arith.truncf %0 : vector<8x16xf32> to vector<8x16xbf16>
    %c0_1 = arith.constant 0 : index
    %c0_2 = arith.constant 0 : index
    %2 = vector.load %arg2[%c0_1, %c0_2] : memref<32x16xbf16, #tpu.memory_space<vmem>>, vector<32x16xbf16>
    %cst = arith.constant dense<0.000000e+00> : vector<32x8xf32>
    %3 = tpu.matmul %2, %1, %cst {dimension_numbers = #tpu.dot_dimension_numbers<[1], [1], [0], [0], [0, 0, 1, 0], [], []>} : vector<32x16xbf16>, vector<8x16xbf16>, vector<32x8xf32> -> vector<32x8xf32>
    %c0_3 = arith.constant 0 : index
    %c0_4 = arith.constant 0 : index
    %4 = vector.load %arg3[%c0_3, %c0_4] : memref<32x1xf32, #tpu.memory_space<vmem>>, vector<32x1xf32>
    %5 = vector.broadcast %4 : vector<32x1xf32> to vector<32x8xf32>
    %6 = arith.addf %3, %5 : vector<32x8xf32>
    %7 = arith.mulf %6, %6 : vector<32x8xf32>
    %8 = arith.mulf %6, %7 : vector<32x8xf32>
    %cst_5 = arith.constant 4.471500e-02 : f32
    %9 = vector.broadcast %cst_5 : f32 to vector<32x8xf32>
    %10 = arith.mulf %9, %8 : vector<32x8xf32>
    %11 = arith.addf %6, %10 : vector<32x8xf32>
    %cst_6 = arith.constant 0.797884583 : f32
    %12 = vector.broadcast %cst_6 : f32 to vector<32x8xf32>
    %13 = arith.mulf %12, %11 : vector<32x8xf32>
    %14 = math.tanh %13 : vector<32x8xf32>
    %cst_7 = arith.constant 1.000000e+00 : f32
    %15 = vector.broadcast %cst_7 : f32 to vector<32x8xf32>
    %16 = arith.addf %15, %14 : vector<32x8xf32>
    %cst_8 = arith.constant 5.000000e-01 : f32
    %17 = vector.broadcast %cst_8 : f32 to vector<32x8xf32>
    %18 = arith.mulf %17, %16 : vector<32x8xf32>
    %19 = arith.mulf %6, %18 : vector<32x8xf32>
    %c0_9 = arith.constant 0 : index
    %c0_10 = arith.constant 0 : index
    %20 = vector.load %arg4[%c0_9, %c0_10] : memref<16x32xbf16, #tpu.memory_space<vmem>>, vector<16x32xbf16>
    %21 = arith.truncf %19 : vector<32x8xf32> to vector<32x8xbf16>
    %cst_11 = arith.constant dense<0.000000e+00> : vector<16x8xf32>
    %22 = tpu.matmul %20, %21, %cst_11 {dimension_numbers = #tpu.dot_dimension_numbers<[1], [0], [0], [1], [0, 0, 1, 1], [], []>} : vector<16x32xbf16>, vector<32x8xbf16>, vector<16x8xf32> -> vector<16x8xf32>
    %c0_12 = arith.constant 0 : index
    %c0_13 = arith.constant 0 : index
    %23 = vector.load %arg5[%c0_12, %c0_13] : memref<16x1xf32, #tpu.memory_space<vmem>>, vector<16x1xf32>
    %24 = vector.broadcast %23 : vector<16x1xf32> to vector<16x8xf32>
    %25 = arith.addf %22, %24 : vector<16x8xf32>
    %26 = vector.extract_strided_slice %25 {offsets = [0, 0], sizes = [8, 8], strides = [1, 1]} : vector<16x8xf32> to vector<8x8xf32>
    %27 = arith.mulf %26, %26 : vector<8x8xf32>
    %cst_14 = arith.constant dense<0.000000e+00> : vector<8xf32>
    %28 = vector.multi_reduction <add>, %27, %cst_14 [0] : vector<8x8xf32> to vector<8xf32>
    %29 = vector.shape_cast %28 : vector<8xf32> to vector<1x8xf32>
    %30 = math.rsqrt %29 : vector<1x8xf32>
    %31 = vector.broadcast %30 : vector<1x8xf32> to vector<8x8xf32>
    %32 = arith.mulf %26, %31 : vector<8x8xf32>
    %c0_15 = arith.constant 0 : index
    %c0_16 = arith.constant 0 : index
    %33 = vector.load %arg6[%c0_15, %c0_16] : memref<16x8xf32, #tpu.memory_space<vmem>>, vector<8x8xf32>
    tpu.vector_store %arg6[%c0_15, %c0_16], %32 {strides = array<i32>} : memref<16x8xf32, #tpu.memory_space<vmem>>, vector<8x8xf32>,
    %34 = vector.extract_strided_slice %25 {offsets = [8, 0], sizes = [8, 8], strides = [1, 1]} : vector<16x8xf32> to vector<8x8xf32>
    %35 = arith.mulf %34, %34 : vector<8x8xf32>
    %cst_17 = arith.constant dense<0.000000e+00> : vector<8xf32>
    %36 = vector.multi_reduction <add>, %35, %cst_17 [0] : vector<8x8xf32> to vector<8xf32>
    %37 = vector.shape_cast %36 : vector<8xf32> to vector<1x8xf32>
    %38 = math.rsqrt %37 : vector<1x8xf32>
    %39 = vector.broadcast %38 : vector<1x8xf32> to vector<8x8xf32>
    %40 = arith.mulf %34, %39 : vector<8x8xf32>
    %c8 = arith.constant 8 : index
    %c0_18 = arith.constant 0 : index
    %41 = vector.load %arg6[%c8, %c0_18] : memref<16x8xf32, #tpu.memory_space<vmem>>, vector<8x8xf32>
    tpu.vector_store %arg6[%c8, %c0_18], %40 {strides = array<i32>} : memref<16x8xf32, #tpu.memory_space<vmem>>, vector<8x8xf32>,
    return
  }
  func.func @transform_0(%arg0: i32) -> (i32, i32) {
    %c0_i32 = arith.constant 0 : i32
    %c0_i32_0 = arith.constant 0 : i32
    return %arg0, %c0_i32 : i32, i32
  }
  func.func @transform_1(%arg0: i32) -> (i32, i32) {
    %c0_i32 = arith.constant 0 : i32
    %c0_i32_0 = arith.constant 0 : i32
    %c0_i32_1 = arith.constant 0 : i32
    return %c0_i32, %c0_i32_0 : i32, i32
  }
  func.func @transform_2(%arg0: i32) -> (i32, i32) {
    %c0_i32 = arith.constant 0 : i32
    %c0_i32_0 = arith.constant 0 : i32
    %c0_i32_1 = arith.constant 0 : i32
    return %c0_i32, %c0_i32_0 : i32, i32
  }
  func.func @transform_3(%arg0: i32) -> (i32, i32) {
    %c0_i32 = arith.constant 0 : i32
    %c0_i32_0 = arith.constant 0 : i32
    %c0_i32_1 = arith.constant 0 : i32
    return %c0_i32, %c0_i32_0 : i32, i32
  }
  func.func @transform_4(%arg0: i32) -> (i32, i32) {
    %c0_i32 = arith.constant 0 : i32
    %c0_i32_0 = arith.constant 0 : i32
    %c0_i32_1 = arith.constant 0 : i32
    return %c0_i32, %c0_i32_0 : i32, i32
  }
  func.func @transform_5(%arg0: i32) -> (i32, i32) {
    %c0_i32 = arith.constant 0 : i32
    %c0_i32_0 = arith.constant 0 : i32
    return %c0_i32, %arg0 : i32, i32
  }
}

</mosaic_0001>

<bundles_post_ra>
// kernel: tpu_custom_call.1
= control target key start
LH: loop header
LB: loop body
LE: loop exit
PB: predicated region body
PF: predicated region fallthrough
CT: control target
= control target key end

     0   :  { %vm61_vm0 = vcmask 130048   ;;  %v296_v1 = vmov 0   ;;  %v297_v12 = vmov 0.0   ;;  %vm298_vm1 = vmmov 0   ;;  %s373_s0 = inlined_call_operand.vmem [shape: f32[8,16], index: 0, kind: input, shape index: {}]   ;;  %s374_s1 = inlined_call_operand.vmem [shape: bf16[32,16], index: 1, kind: input, shape index: {}]   ;;  %s375_s2 = inlined_call_operand.vmem [shape: f32[32,1], index: 2, kind: input, shape index: {}]   ;;  %s376_s4 = inlined_call_operand.vmem [shape: f32[16,1], index: 4, kind: input, shape index: {}]   ;;  %s377_s3 = inlined_call_operand.vmem [shape: bf16[16,32], index: 3, kind: input, shape index: {}]   ;;  %s378_s5 = inlined_call_operand.vmem [shape: f32[16,8], index: 5, kind: output, shape index: {}]  }
   0x1   :  { %v21_v0 = vld [vmem:[%s373_s0] sm:$0xff]  ;;  %279 = vset.pattern.permute.xlu0 %v296_v1  ;;  %280 = vset.pattern.permute.xlu1 %v296_v1  ;;  %v29_v5 = vld [vmem:[%s375_s2 + $0x10] sm:$0xff]  ;;  %v28_v7 = vld [vmem:[%s375_s2 + $0x8] sm:$0xff]  ;;  %vm177_vm2 = vcmask 261120   ;;  %vm223_vm3 = vcmask 64512  }
   0x2   :  { %v22_v2 = vpack.c.bf16 %v21_v0, %v21_v0  ;;  %v281_v3 = vld [vmem:[%s374_s1] sm:$0xff]   ;;  %43 = vperm.xlu1 %280, %v29_v5   ;;  %v30_v8 = vld [vmem:[%s375_s2 + $0x18] sm:$0xff]  ;;  %v282_v9 = vld [vmem:[%s374_s1 + $0x8] sm:$0xff]   ;;  %267 = vmatprep.subr.bf16.mxu1 %v297_v12 }
   0x3   :  { %v27_v4 = vld [vmem:[%s375_s2] sm:$0xff]  ;;  %263 = vmatprep.mubr.msk.bf16.mxu0 %vm61_vm0, %v281_v3  ;;  %v161_v11 = vld [vmem:[%s376_s4 + $0x8] sm:$0xff]  ;;  %271 = vmatprep.mubr.msk.bf16.mxu1 %vm298_vm1, %v297_v12 }
   0x4   :  { %275 = vmatprep.subr.msk.bf16.mxu0 %vm61_vm0, %v22_v2  ;;  %v69_v6 = vsel %vm61_vm0, %v22_v2, 0  ;;  %33 = vperm.xlu0 %279, %v27_v4   ;;  %v160_v10 = vld [vmem:[%s376_s4] sm:$0xff] }
   0x5   :  { %262 = vmatpush3.bf16.xpose.msra.mxu0 %v69_v6  ;;  %v283_v63 = vld [vmem:[%s377_s3] sm:$0xff]  }
   0x6   :  { %48 = vperm.xlu1 %280, %v30_v8  }
   0x8   :  { %38 = vperm.xlu0 %279, %v28_v7  }
   0xa   :  { %169 = vperm.xlu1 %280, %v161_v11  }
   0xc   :  { %264 = vmatmul.mubr.msk.bf16.vlgmr.msra.gmra.mrb[0].mxu0 %vm61_vm0, %v282_v9  ;;  %164 = vperm.xlu0 %279, %v160_v10  }
  0x81   :  { %v44_v13 = vpop.permute.xlu1 %43 }
  0x83   :  { %v34_v14 = vpop.permute.xlu0 %33 }
  0x85   :  { %v49_v18 = vpop.permute.xlu1 %48 }
  0x87   :  { %v39_v21 = vpop.permute.xlu0 %38 }
  0x89   :  { %v170_v4 = vpop.permute.xlu1 %169 }
  0x8b   :  { %v165_v0 = vpop.permute.xlu0 %164 }
  0xdf   :  { %v265_v15 = vpop.f32.mrb[0].mxu0 }
  0xe0   :  { %v114_v16 = vadd.f32 %v265_v15, %v44_v13  ;;  %v105_v17 = vpop.f32.mrb[1].mxu0 }
  0xe1   :  { %v106_v19 = vadd.f32 %v105_v17, %v34_v14  ;;  %v266_v20 = vpop.f32.mrb[2].mxu0 }
  0xe2   :  { %v122_v22 = vmul.f32 %v114_v16, %v114_v16  ;;  %v117_v23 = vadd.f32 %v266_v20, %v49_v18  ;;  %v108_v24 = vpop.f32.mrb[3].mxu0 }
  0xe3   :  { %v120_v25 = vmul.f32 %v106_v19, %v106_v19  ;;  %v109_v26 = vadd.f32 %v108_v24, %v39_v21 }
  0xe4   :  { %v126_v27 = vmul.f32 %v122_v22, %v114_v16  ;;  %v123_v28 = vmul.f32 %v117_v23, %v117_v23 }
  0xe5   :  { %v124_v29 = vmul.f32 %v120_v25, %v106_v19  ;;  %v121_v30 = vmul.f32 %v109_v26, %v109_v26 }
  0xe6   :  { %v130_v31 = vmul.f32 0.044715, %v126_v27  ;;  %v127_v32 = vmul.f32 %v123_v28, %v117_v23 }
  0xe7   :  { %v128_v33 = vmul.f32 0.044715, %v124_v29  ;;  %v125_v34 = vmul.f32 %v121_v30, %v109_v26 }
  0xe8   :  { %v134_v35 = vadd.f32 %v130_v31, %v114_v16  ;;  %v131_v36 = vmul.f32 0.044715, %v127_v32 }
  0xe9   :  { %v132_v37 = vadd.f32 %v128_v33, %v106_v19  ;;  %v129_v38 = vmul.f32 0.044715, %v125_v34 }
  0xea   :  { %v138_v39 = vmul.f32 0.7978846, %v134_v35  ;;  %v135_v40 = vadd.f32 %v131_v36, %v117_v23 }
  0xeb   :  { %v136_v41 = vmul.f32 0.7978846, %v132_v37  ;;  %v133_v42 = vadd.f32 %v129_v38, %v109_v26 }
  0xec   :  { %284 = vtanh.f32 %v138_v39  ;;  %v139_v43 = vmul.f32 0.7978846, %v135_v40 }
  0xed   :  { %v137_v44 = vmul.f32 0.7978846, %v133_v42  ;;  %286 = vtanh.f32 %v136_v41 }
  0xee   :  { %288 = vtanh.f32 %v139_v43 }
  0xef   :  { %290 = vtanh.f32 %v137_v44 }
  0xf6   :  { %v285_v45 = vpop.eup %284 }
  0xf7   :  { %v287_v46 = vpop.eup %286  ;;  %v146_v47 = vadd.f32 1.0, %v285_v45 }
  0xf8   :  { %v289_v48 = vpop.eup %288  ;;  %v144_v49 = vadd.f32 1.0, %v287_v46 }
  0xf9   :  { %v291_v50 = vpop.eup %290  ;;  %v147_v51 = vadd.f32 1.0, %v289_v48  ;;  %v150_v52 = vmul.f32 0.5, %v146_v47 }
  0xfa   :  { %v145_v53 = vadd.f32 1.0, %v291_v50  ;;  %v148_v54 = vmul.f32 0.5, %v144_v49 }
  0xfb   :  { %v151_v55 = vmul.f32 0.5, %v147_v51  ;;  %v154_v57 = vmul.f32 %v150_v52, %v114_v16 }
  0xfc   :  { %v149_v56 = vmul.f32 0.5, %v145_v53  ;;  %v152_v59 = vmul.f32 %v148_v54, %v106_v19 }
  0xfd   :  { %v155_v58 = vmul.f32 %v151_v55, %v117_v23 }
  0xfe   :  { %v153_v60 = vmul.f32 %v149_v56, %v109_v26 }
  0xff   :  { %v159_v61 = vpack.c.bf16 %v155_v58, %v154_v57 }
 0x100   :  { %v158_v62 = vpack.c.bf16 %v153_v60, %v152_v59 }
 0x102   :  { %268 = vmatpush3.bf16.msra.mxu1 %v158_v62 }
 0x103   :  { %269 = vmatprep.subr.bf16.mxu1 %v297_v12 }
 0x106   :  { %270 = vmatpush3.bf16.msra.mxu1 %v159_v61 }
 0x109   :  { %272 = vmatmul.mubr.msk.bf16.vlgmr.msra.gmra.mrb[0].mxu1 %vm177_vm2, %v283_v63 }
 0x1dc   :  { %v215_v1 = vpop.f32.mrb[0].mxu1 }
 0x1dd   :  { %v216_v2 = vadd.f32 %v215_v1, %v165_v0  ;;  %v273_v3 = vpop.f32.mrb[1].mxu1 }
 0x1de   :  { %v218_v5 = vpop.f32.mrb[2].mxu1 }
 0x1df   :  { %v222_v6 = vmul.f32 %v216_v2, %v216_v2  ;;  %v219_v7 = vadd.f32 %v218_v5, %v170_v4  ;;  %v274_v8 = vpop.f32.mrb[3].mxu1 }
 0x1e1   :  { %v224_v9 = vsel %vm223_vm3, %v222_v6, 0.0  ;;  %v234_v10 = vmul.f32 %v219_v7, %v219_v7 }
 0x1e2   :  { %v225_v11 = vrot.slane %v224_v9, 4 }
 0x1e3   :  { %v235_v12 = vsel %vm223_vm3, %v234_v10, 0.0 }
 0x1e4   :  { %v226_v13 = vadd.f32 %v225_v11, %v224_v9  ;;  %v236_v14 = vrot.slane %v235_v12, 4 }
 0x1e6   :  { %v227_v15 = vrot.slane %v226_v13, 2  ;;  %v237_v16 = vadd.f32 %v236_v14, %v235_v12 }
 0x1e8   :  { %v228_v17 = vadd.f32 %v227_v15, %v226_v13  ;;  %v238_v18 = vrot.slane %v237_v16, 2 }
 0x1ea   :  { %v229_v19 = vrot.slane %v228_v17, 1  ;;  %v239_v20 = vadd.f32 %v238_v18, %v237_v16 }
 0x1ec   :  { %v230_v21 = vadd.f32 %v229_v19, %v228_v17  ;;  %v240_v22 = vrot.slane %v239_v20, 1 }
 0x1ee   :  { %292 = vrsqrt.f32 %v230_v21  ;;  %v241_v23 = vadd.f32 %v240_v22, %v239_v20 }
 0x1f0   :  { %294 = vrsqrt.f32 %v241_v23 }
 0x1f8   :  { %v293_v24 = vpop.eup %292 }
 0x1f9   :  { %v232_v25 = vmul.f32 %v293_v24, %v216_v2 }
 0x1fa   :  { %v295_v26 = vpop.eup %294 }
 0x1fb   :  { %233 = vst.msk [vmem:[%s378_s5] sm:$0xff] %vm223_vm3, %v232_v25  ;;  %v243_v27 = vmul.f32 %v295_v26, %v219_v7 }
 0x1fd   :  { %244 = vst.msk [vmem:[%s378_s5 + $0x8] sm:$0xff] %vm223_vm3, %v243_v27 }

</bundles_post_ra>
